<compile_context>
chip_gen: v6e
topology: v6e:2x2x1
jax: 0.10.0
libtpu: 0.0.40
codegen_flags: <defaults>
</compile_context>

<pallas_src>
import functools

import jax
import jax.numpy as jnp
import numpy as np
from jax.experimental import pallas as pl
from jax.experimental.pallas import tpu as pltpu


def _round_up(x, m):
    return (x + m - 1) // m * m


def _choose_tm(n, tm_max):
    """Token-tile rows: multiple of 8, >= 2 grid steps when possible, even
    step count preferred (v7x megacore balance), capped at tm_max."""
    if n <= 8:
        return n  # block == full array dim is always legal
    tm = max(8, min(tm_max, _round_up(pl.cdiv(n, 2), 8)))
    steps = pl.cdiv(n, tm)
    if steps > 2 and steps % 2 == 1:  # nudge to an even number of steps
        tm_even = max(8, _round_up(pl.cdiv(n, steps + 1), 8))
        if pl.cdiv(n, tm_even) % 2 == 0:
            tm = tm_even
    return tm


# ---------------------------------------------------------------------------
# Pallas kernel: LayerNorm (stats only; affine pre-folded into W/b) + Linear,
# with the normalization applied in the matmul epilogue.
# ---------------------------------------------------------------------------
def _spt_ln_linear_kernel(x_ref, w_ref, b_ref, wsum_ref, o_ref):
    # x_ref:    (TM, patch_dim)  token tile
    # w_ref:    (patch_dim, dim) gamma-folded, feature-permuted weight
    # b_ref:    (1, dim)         beta-folded bias   (beta @ W + b)
    # wsum_ref: (1, dim)         column sums of w_ref
    # o_ref:    (TM, dim)
    x = x_ref[...].astype(jnp.float32)
    inv_k = 1.0 / x.shape[-1]

    # Single-pass LN statistics (biased variance, eps = 1e-5).
    s = jnp.sum(x, axis=-1, keepdims=True)
    ss = jnp.sum(x * x, axis=-1, keepdims=True)
    mean = s * inv_k
    var = ss * inv_k - mean * mean
    r = jax.lax.rsqrt(var + 1e-5)

    # ((x - mean) * r) @ W == r * (x @ W) - (r * mean) * colsum(W)
    y = jnp.dot(x, w_ref[...], preferred_element_type=jnp.float32)
    o_ref[...] = (r * y - (r * mean) * wsum_ref[...] + b_ref[...]).astype(o_ref.dtype)


def spt_ln_linear(tokens, w_folded, b_folded, w_colsum, *, tm_max=1024):
    """tokens: (N, patch_dim) f32, features in (c, p1, p2) order.
    Returns (N, dim) f32.  Ragged N is handled by the pipeline (no pad/slice)."""
    n, patch_dim = tokens.shape
    dim = w_folded.shape[1]
    # tm_max=1024 is a good default for v5e/v6e; on v7x with very large N a
    # caller can pass tm_max=2048+ (still tiny vs the 64 MiB VMEM).
    tm = _choose_tm(n, tm_max)
    steps = pl.cdiv(n, tm)

    cost = pl.CostEstimate(
        flops=2 * n * patch_dim * dim,
        transcendentals=0,
        bytes_accessed=n * (patch_dim + dim) * 4 + (patch_dim + 2) * dim * 4,
    )

    return pl.pallas_call(
        _spt_ln_linear_kernel,
        out_shape=jax.ShapeDtypeStruct((n, dim), jnp.float32),
        grid_spec=pltpu.PrefetchScalarGridSpec(
            num_scalar_prefetch=0,
            grid=(steps,),
            in_specs=[
                pl.BlockSpec((tm, patch_dim), lambda i: (i, 0)),
                pl.BlockSpec((patch_dim, dim), lambda i: (0, 0)),
                pl.BlockSpec((1, dim), lambda i: (0, 0)),
                pl.BlockSpec((1, dim), lambda i: (0, 0)),
            ],
            out_specs=pl.BlockSpec((tm, dim), lambda i: (i, 0)),
        ),
        compiler_params=pltpu.CompilerParams(
            dimension_semantics=("parallel",),
            vmem_limit_bytes=32 * 1024 * 1024,
        ),
        cost_estimate=cost,
    )(tokens, w_folded, b_folded, w_colsum)


# ---------------------------------------------------------------------------
# One-time parameter preparation (do at init, NOT per forward call).
# ---------------------------------------------------------------------------
def prepare_spt_params(params, *, patch_size, channels=3):
    p = patch_size
    c5 = 5 * channels
    patch_dim = p * p * c5
    gamma = params["ln_gamma"].astype(jnp.float32)
    beta = params["ln_beta"].astype(jnp.float32)
    w = params["lin_w"].astype(jnp.float32)  # (patch_dim, dim) == torch weight.T
    b = params["lin_b"].astype(jnp.float32)

    # Fold the LN affine:  ln(x) @ W + b == xhat @ (gamma[:,None]*W) + (beta@W + b)
    w_f = gamma[:, None] * w
    b_f = (beta @ w + b).reshape(1, -1)

    # Permute W rows from torch feature order (p1, p2, c) to the kernel's
    # (c, p1, p2) order.  LN stats are permutation-invariant, so only W moves.
    perm = np.arange(patch_dim).reshape(p, p, c5).transpose(2, 0, 1).reshape(-1)
    w_f = w_f[perm]
    w_colsum = jnp.sum(w_f, axis=0, keepdims=True)
    return {"w": w_f, "b": b_f, "wsum": w_colsum}


# ---------------------------------------------------------------------------
# Plain-JAX glue: shifted copies + patch rearrange (matches torch semantics).
# ---------------------------------------------------------------------------
def _shift_windows(x):
    """Identity + the 4 torch F.pad shifts, stacked along channels: (B,5C,H,W)."""
    B, C, H, W = x.shape
    xp = jnp.pad(x, ((0, 0), (0, 0), (1, 1), (1, 1)))
    # (dh, dw) windows into the 1-pixel-padded image for:
    # identity, (1,-1,0,0), (-1,1,0,0), (0,0,1,-1), (0,0,-1,1)
    offs = ((1, 1), (1, 0), (1, 2), (0, 1), (2, 1))
    return jnp.concatenate([xp[:, :, dh:dh + H, dw:dw + W] for dh, dw in offs], axis=1)


def spt_forward(x, prepared, *, patch_size):
    """x: (B, C, H, W) NCHW.  Returns (B, num_patches, dim)."""
    B, C, H, W = x.shape
    p = patch_size
    hb, wb = H // p, W // p
    c5 = 5 * C
    x5 = _shift_windows(x)
    # Token relayout with features in (c, p1, p2) order: this transpose keeps
    # p2 as the minor (lane) dim, so the producer relayout is much cheaper
    # than the torch (p1 p2 c) order; the matching W-row permutation was
    # folded into the weights in prepare_spt_params.
    # TODO(synk): the 5 shifted windows could instead be gathered with manual
    # DMAs from the padded image inside the kernel (pl.ANY operand) to avoid
    # materializing the 5x-sized token tensor in HBM at all.
    xr = x5.reshape(B, c5, hb, p, wb, p)
    xr = jnp.transpose(xr, (0, 2, 4, 1, 3, 5))  # (B, hb, wb, c5, p1, p2)
    tokens = xr.reshape(B * hb * wb, c5 * p * p)
    out = spt_ln_linear(tokens, prepared["w"], prepared["b"], prepared["wsum"])
    return out.reshape(B, hb * wb, -1)


# ---------------------------------------------------------------------------
# Reference (pure JAX, original feature order, un-folded math).
# ---------------------------------------------------------------------------
def spt_reference(x, params, *, patch_size):
    B, C, H, W = x.shape
    p = patch_size
    hb, wb = H // p, W // p
    c5 = 5 * C
    x5 = _shift_windows(x)
    xr = x5.reshape(B, c5, hb, p, wb, p)
    xr = jnp.transpose(xr, (0, 2, 4, 3, 5, 1))  # torch (p1 p2 c) order
    tokens = xr.reshape(B, hb * wb, p * p * c5)
    mean = jnp.mean(tokens, axis=-1, keepdims=True)
    var = jnp.mean((tokens - mean) ** 2, axis=-1, keepdims=True)
    xn = (tokens - mean) / jnp.sqrt(var + 1e-5)
    xn = xn * params["ln_gamma"] + params["ln_beta"]
    return (
        jnp.matmul(xn, params["lin_w"], precision=jax.lax.Precision.HIGHEST)
        + params["lin_b"]
    )


if __name__ == "__main__":
    patch_size = 4
    dim = 32
    C = 3
    patch_dim = patch_size * patch_size * 5 * C  # 240

    key = jax.random.PRNGKey(0)
    kx, kx2, kg, kb, kw, kbias = jax.random.split(key, 6)

    params = {
        "ln_gamma": 1.0 + 0.1 * jax.random.normal(kg, (patch_dim,), jnp.float32),
        "ln_beta": 0.1 * jax.random.normal(kb, (patch_dim,), jnp.float32),
        # Linear weight stored as (patch_dim, dim) = torch weight.T
        "lin_w": jax.random.normal(kw, (patch_dim, dim), jnp.float32)
        / np.sqrt(patch_dim),
        "lin_b": 0.01 * jax.random.normal(kbias, (dim,), jnp.float32),
    }
    prepared = prepare_spt_params(params, patch_size=patch_size, channels=C)

    fwd = jax.jit(
        functools.partial(spt_forward, prepared=prepared, patch_size=patch_size)
    )

    # Case 1: small image, token count (32) divides the tile exactly.
    B, H, W = 2, 16, 16
    x = jax.random.normal(kx, (B, C, H, W), dtype=jnp.float32)
    out = jax.block_until_ready(fwd(x))
    ref = spt_reference(x, params, patch_size=patch_size)
    assert out.shape == (B, (H // patch_size) * (W // patch_size), dim)
    np.testing.assert_allclose(np.asarray(out), np.asarray(ref), rtol=2e-4, atol=2e-4)

    # Case 2: ragged token count (B*hb*wb = 50) exercises the partial-block path.
    B2, H2, W2 = 2, 20, 20
    x2 = jax.random.normal(kx2, (B2, C, H2, W2), dtype=jnp.float32)
    out2 = jax.block_until_ready(fwd(x2))
    ref2 = spt_reference(x2, params, patch_size=patch_size)
    assert out2.shape == (B2, (H2 // patch_size) * (W2 // patch_size), dim)
    np.testing.assert_allclose(np.asarray(out2), np.asarray(ref2), rtol=2e-4, atol=2e-4)

    print("KERNEL_OK")
</pallas_src>

<mosaic_0001>
module attributes {stable_mosaic.version = 11 : i64} {
  func.func @_spt_ln_linear_kernel(%arg0: i32, %arg1: memref<16x240xf32, #tpu.memory_space<vmem>>, %arg2: memref<240x32xf32, #tpu.memory_space<vmem>>, %arg3: memref<1x32xf32, #tpu.memory_space<vmem>>, %arg4: memref<1x32xf32, #tpu.memory_space<vmem>>, %arg5: memref<16x32xf32, #tpu.memory_space<vmem>>) attributes {dimension_semantics = [#tpu.dimension_semantics<parallel>], iteration_bounds = array<i64: 2>, scalar_prefetch = 0 : i64, scratch_operands = 0 : i64, tpu.core_type = #tpu.core_type<tc>, window_params = [{transform_indices = @transform_0, window_bounds = array<i64: 16, 240>}, {pipeline_mode = #tpu.pipeline_mode<synchronous>, transform_indices = @transform_1, window_bounds = array<i64: 240, 32>}, {pipeline_mode = #tpu.pipeline_mode<synchronous>, transform_indices = @transform_2, window_bounds = array<i64: 1, 32>}, {pipeline_mode = #tpu.pipeline_mode<synchronous>, transform_indices = @transform_3, window_bounds = array<i64: 1, 32>}, {transform_indices = @transform_4, window_bounds = array<i64: 16, 32>}]} {
    %c0 = arith.constant 0 : index
    %c0_0 = arith.constant 0 : index
    %0 = vector.load %arg1[%c0, %c0_0] : memref<16x240xf32, #tpu.memory_space<vmem>>, vector<16x240xf32>
    %cst = arith.constant dense<0.000000e+00> : vector<16xf32>
    %1 = vector.multi_reduction <add>, %0, %cst [1] : vector<16x240xf32> to vector<16xf32>
    %2 = vector.shape_cast %1 : vector<16xf32> to vector<16x1xf32>
    %3 = arith.mulf %0, %0 : vector<16x240xf32>
    %cst_1 = arith.constant dense<0.000000e+00> : vector<16xf32>
    %4 = vector.multi_reduction <add>, %3, %cst_1 [1] : vector<16x240xf32> to vector<16xf32>
    %5 = vector.shape_cast %4 : vector<16xf32> to vector<16x1xf32>
    %cst_2 = arith.constant 0.00416666688 : f32
    %6 = vector.broadcast %cst_2 : f32 to vector<16x1xf32>
    %7 = arith.mulf %2, %6 : vector<16x1xf32>
    %cst_3 = arith.constant 0.00416666688 : f32
    %8 = vector.broadcast %cst_3 : f32 to vector<16x1xf32>
    %9 = arith.mulf %5, %8 : vector<16x1xf32>
    %10 = arith.mulf %7, %7 : vector<16x1xf32>
    %11 = arith.subf %9, %10 : vector<16x1xf32>
    %cst_4 = arith.constant 9.99999974E-6 : f32
    %12 = vector.broadcast %cst_4 : f32 to vector<16x1xf32>
    %13 = arith.addf %11, %12 : vector<16x1xf32>
    %14 = math.rsqrt %13 : vector<16x1xf32>
    %c0_5 = arith.constant 0 : index
    %c0_6 = arith.constant 0 : index
    %15 = vector.load %arg2[%c0_5, %c0_6] : memref<240x32xf32, #tpu.memory_space<vmem>>, vector<240x32xf32>
    %cst_7 = arith.constant dense<0.000000e+00> : vector<16x32xf32>
    %16 = tpu.matmul %0, %15, %cst_7 {dimension_numbers = #tpu.dot_dimension_numbers<[1], [0], [0], [1], [0, 0, 1, 1], [], []>} : vector<16x240xf32>, vector<240x32xf32>, vector<16x32xf32> -> vector<16x32xf32>
    %17 = vector.broadcast %14 : vector<16x1xf32> to vector<16x32xf32>
    %18 = arith.mulf %17, %16 : vector<16x32xf32>
    %19 = arith.mulf %14, %7 : vector<16x1xf32>
    %c0_8 = arith.constant 0 : index
    %c0_9 = arith.constant 0 : index
    %20 = vector.load %arg4[%c0_8, %c0_9] : memref<1x32xf32, #tpu.memory_space<vmem>>, vector<1x32xf32>
    %21 = vector.broadcast %19 : vector<16x1xf32> to vector<16x32xf32>
    %22 = vector.broadcast %20 : vector<1x32xf32> to vector<16x32xf32>
    %23 = arith.mulf %21, %22 : vector<16x32xf32>
    %24 = arith.subf %18, %23 : vector<16x32xf32>
    %c0_10 = arith.constant 0 : index
    %c0_11 = arith.constant 0 : index
    %25 = vector.load %arg3[%c0_10, %c0_11] : memref<1x32xf32, #tpu.memory_space<vmem>>, vector<1x32xf32>
    %26 = vector.broadcast %25 : vector<1x32xf32> to vector<16x32xf32>
    %27 = arith.addf %24, %26 : vector<16x32xf32>
    %c0_12 = arith.constant 0 : index
    %c0_13 = arith.constant 0 : index
    %28 = vector.load %arg5[%c0_12, %c0_13] : memref<16x32xf32, #tpu.memory_space<vmem>>, vector<16x32xf32>
    tpu.vector_store %arg5[%c0_12, %c0_13], %27 {strides = array<i32>} : memref<16x32xf32, #tpu.memory_space<vmem>>, vector<16x32xf32>,
    return
  }
  func.func @transform_0(%arg0: i32) -> (i32, i32) {
    %c0_i32 = arith.constant 0 : i32
    %c0_i32_0 = arith.constant 0 : i32
    return %arg0, %c0_i32 : i32, i32
  }
  func.func @transform_1(%arg0: i32) -> (i32, i32) {
    %c0_i32 = arith.constant 0 : i32
    %c0_i32_0 = arith.constant 0 : i32
    %c0_i32_1 = arith.constant 0 : i32
    return %c0_i32, %c0_i32_0 : i32, i32
  }
  func.func @transform_2(%arg0: i32) -> (i32, i32) {
    %c0_i32 = arith.constant 0 : i32
    %c0_i32_0 = arith.constant 0 : i32
    %c0_i32_1 = arith.constant 0 : i32
    return %c0_i32, %c0_i32_0 : i32, i32
  }
  func.func @transform_3(%arg0: i32) -> (i32, i32) {
    %c0_i32 = arith.constant 0 : i32
    %c0_i32_0 = arith.constant 0 : i32
    %c0_i32_1 = arith.constant 0 : i32
    return %c0_i32, %c0_i32_0 : i32, i32
  }
  func.func @transform_4(%arg0: i32) -> (i32, i32) {
    %c0_i32 = arith.constant 0 : i32
    %c0_i32_0 = arith.constant 0 : i32
    return %arg0, %c0_i32 : i32, i32
  }
}

</mosaic_0001>

<bundles_post_ra>
// kernel: spt_forward.1
= control target key start
LH: loop header
LB: loop body
LE: loop exit
PB: predicated region body
PF: predicated region fallthrough
CT: control target
= control target key end

     0   :  { %9 = vsyncpa [#allocation3], 0  ;;  %s938_s0 = inlined_call_operand.vmem [shape: f32[32,240], index: 0, kind: input, shape index: {}]   ;;  %s939_s1 = inlined_call_operand.vmem [shape: f32[240,32], index: 1, kind: input, shape index: {}]   ;;  %s940_s2 = inlined_call_operand.vmem [shape: f32[1,32], index: 2, kind: input, shape index: {}]   ;;  %s941_s3 = inlined_call_operand.vmem [shape: f32[1,32], index: 3, kind: input, shape index: {}]   ;;  %s942_s4 = inlined_call_operand.hbm [shape: f32[32,32], index: 4, kind: output, shape index: {}]  }
   0x1   :  { %11 = vsyncpa [#allocation3 + $0x1], 0  ;;  %s669_s15 = smov 0   ;;  %s671_s16 = smov 0  }
   0x2   :  { %s673_s17 = smov 0   ;;  %s675_s18 = smov 0  }
   0x3 LB: > { %s690_s19 = sadd.s32 4294967295, %s638_s18   ;;  %s453_s20 = sadd.s32 4294967294, %s638_s18   ;;  %s638_s18 = sphi %s675_s18, %s948_s18   ;;  %s634_s17 = sphi %s673_s17, %s947_s17   ;;  %s630_s16 = sphi %s671_s16, %s946_s16   ;;  %s626_s15 = sphi %s669_s15, %s945_s15  }
   0x4   : > { %s694_s21 = sadd.s32 1, %s638_s18   ;;  %s113_s22 = sadd.s32 1, %s634_s17 }
   0x5   : > { %s110_s23 = ssub.s32 %s638_s18, %s694_s21  ;;  %p123_p0 = scmp.ne.s32.totalorder %s634_s17, %s630_s16 }
   0x6   : > { %p111_p1 = scmp.eq.s32.totalorder %s110_s23, 0  ;;  %p124_p2 = scmp.eq.s32.totalorder %s690_s19, 1 }
   0x7   : > { %p129_p3 = scmp.ne.s32.totalorder %s630_s16, %s626_s15  ;;  %p130_p4 = scmp.eq.s32.totalorder %s453_s20, 1 }
   0x8   : > { %s705_s24 = scalar_select %p111_p1, %s634_s17, %s113_s22  }
   0x9   : > { %p707_p5 = por %p124_p2, %p123_p0  ;;  %p711_p6 = por %p130_p4, %p129_p3 }
   0xa   : > { %p456_p7 = scmp.ge.s32.totalorder %s638_s18, 1  ;;  %p167_p8 = scmp.lt.s32.totalorder %s638_s18, 3 }
   0xc   : > { %p168_p9 = pnand %p456_p7, %p167_p8 }
   0xd   : > { %s458_s29 = sshll.u32 (!%p168_p9), %s690_s19, 1  ;;  %s191_s20 = sand.u32 (!%p168_p9), 1, %s630_s16  }
   0xe   : > { %171 = sbr.rel (%p168_p9) target bundleno = 294 (0x126), region = 36  ;;  %p195_p10 = scmp.lt.s32.totalorder (!%p168_p9), %s458_s29, 3 }
   0xf   : > { %s471_s28 = sshll.u32 (!%p168_p9), %s690_s19, 8  ;;  %s898_s19 = scalar_lea.sflag (!%p168_p9), [#allocation3], %s191_s20 }
  0x10   : > { %s894_s9 = scalar_lea.hbm (!%p168_p9), %s942_s4, %s471_s28  ;;  %s641_s11 = smov (!%p168_p9), [#allocation2]  }
  0x11   : > { %s582_s12 = sshll.u32 (!%p168_p9), %s641_s11, 4  ;;  %s583_s12 = int_to_ptr.vmem [resolvable:$false] %s582_s12 }
  0x12   : > { %s584_s13 = scalar_lea.vmem (!%p168_p9), %s583_s12, 512 }
  0x13   : > { %v254_v0 = vld [vmem:[%s939_s1 + $0x78] sm:$0xff]  ;;  %v640_v1 = vmov 0.0   ;;  %v253_v2 = vld [vmem:[%s939_s1 + $0x70] sm:$0xff]  ;;  %v252_v3 = vld [vmem:[%s939_s1 + $0x68] sm:$0xff]  ;;  %s950_s29 = smov (!%p195_p10, %s458_s29), 3  ;;  %vm206_vm0 = vcmask 916480  }
  0x14   : > { %275 = vmatprep.subr.mxu0 %v640_v1  ;;  %472 = vmatprep.subr.mxu1 %v640_v1  ;;  %v251_v4 = vld [vmem:[%s939_s1 + $0x60] sm:$0xff]  ;;  %v250_v5 = vld [vmem:[%s939_s1 + $0x58] sm:$0xff]  ;;  %v249_v6 = vld [vmem:[%s939_s1 + $0x50] sm:$0xff]  ;;  %s470_s22 = sshll.u32 %s950_s29, 4  ;;  %vm374_vm1 = vcmask 261120  }
  0x15   : > { %276 = vmatpush1.msra.mxu0 %v254_v0  ;;  %502 = vmatpush1.msra.mxu1 %v254_v0  ;;  %v248_v7 = vld [vmem:[%s939_s1 + $0x48] sm:$0xff]  ;;  %v247_v8 = vld [vmem:[%s939_s1 + $0x40] sm:$0xff]  ;;  %v246_v9 = vld [vmem:[%s939_s1 + $0x38] sm:$0xff]  ;;  %s844_s5 = scalar_lea.vmem %s938_s0, %s470_s22  ;;  %s457_s22 = sshll.u32 %s191_s20, 4 }
  0x16   : > { %277 = vmatprep.subr.mxu0 %v640_v1  ;;  %473 = vmatprep.subr.mxu1 %v640_v1  ;;  %v245_v10 = vld [vmem:[%s939_s1 + $0x30] sm:$0xff]  ;;  %v244_v11 = vld [vmem:[%s939_s1 + $0x28] sm:$0xff]  ;;  %v243_v12 = vld [vmem:[%s939_s1 + $0x20] sm:$0xff]  ;;  %s193_s30 = scalar_lea.vmem [#allocation2], %s457_s22 }
  0x17   : > { %278 = vmatpush1.msra.mxu0 %v253_v2  ;;  %503 = vmatpush1.msra.mxu1 %v253_v2  ;;  %v242_v13 = vld [vmem:[%s939_s1 + $0x18] sm:$0xff]  ;;  %v241_v14 = vld [vmem:[%s939_s1 + $0x10] sm:$0xff]  ;;  %v240_v15 = vld [vmem:[%s939_s1 + $0x8] sm:$0xff] }
  0x18   : > { %279 = vmatprep.subr.mxu0 %v640_v1  ;;  %474 = vmatprep.subr.mxu1 %v640_v1  ;;  %v239_v16 = vld [vmem:[%s939_s1] sm:$0xff]  ;;  %v268_v17 = vld [vmem:[%s939_s1 + $0xe8] sm:$0xff]  ;;  %v266_v19 = vld [vmem:[%s939_s1 + $0xd8] sm:$0xff] }
  0x19   : > { %280 = vmatpush1.msra.mxu0 %v252_v3  ;;  %504 = vmatpush1.msra.mxu1 %v252_v3  ;;  %v267_v18 = vld [vmem:[%s939_s1 + $0xe0] sm:$0xff]  ;;  %v265_v20 = vld [vmem:[%s939_s1 + $0xd0] sm:$0xff]  ;;  %v264_v21 = vld [vmem:[%s939_s1 + $0xc8] sm:$0xff] }
  0x1a   : > { %281 = vmatprep.subr.mxu0 %v640_v1  ;;  %475 = vmatprep.subr.mxu1 %v640_v1  ;;  %v263_v22 = vld [vmem:[%s939_s1 + $0xc0] sm:$0xff]  ;;  %v262_v23 = vld [vmem:[%s939_s1 + $0xb8] sm:$0xff]  ;;  %v261_v24 = vld [vmem:[%s939_s1 + $0xb0] sm:$0xff] }
  0x1b   : > { %282 = vmatpush1.msra.mxu0 %v251_v4  ;;  %505 = vmatpush1.msra.mxu1 %v251_v4  ;;  %v260_v25 = vld [vmem:[%s939_s1 + $0xa8] sm:$0xff]  ;;  %v259_v26 = vld [vmem:[%s939_s1 + $0xa0] sm:$0xff]  ;;  %v258_v27 = vld [vmem:[%s939_s1 + $0x98] sm:$0xff] }
  0x1c   : > { %283 = vmatprep.subr.mxu0 %v640_v1  ;;  %476 = vmatprep.subr.mxu1 %v640_v1  ;;  %v203_v28 = vld [vmem:[%s844_s5 + $0x8] sm:$0xff]  ;;  %v257_v30 = vld [vmem:[%s939_s1 + $0x90] sm:$0xff]  ;;  %v202_v31 = vld [vmem:[%s844_s5] sm:$0xff] }
  0x1d   : > { %284 = vmatpush1.msra.mxu0 %v250_v5  ;;  %506 = vmatpush1.msra.mxu1 %v250_v5  ;;  %v216_v29 = vmul.f32 %v203_v28, %v203_v28  ;;  %v256_v32 = vld [vmem:[%s939_s1 + $0x88] sm:$0xff]  ;;  %v205_v33 = vld [vmem:[%s844_s5 + $0x18] sm:$0xff]  ;;  %v215_v34 = vmul.f32 %v202_v31, %v202_v31  ;;  %v207_v36 = vsel %vm206_vm0, %v203_v28, 0.0  ;;  %v255_v38 = vld [vmem:[%s939_s1 + $0x80] sm:$0xff] }
  0x1e   : > { %285 = vmatprep.subr.mxu0 %v640_v1  ;;  %477 = vmatprep.subr.mxu1 %v640_v1  ;;  %v218_v35 = vmul.f32 %v205_v33, %v205_v33  ;;  %v204_v39 = vld [vmem:[%s844_s5 + $0x10] sm:$0xff]  ;;  %v208_v40 = vadd.f32 %v207_v36, %v202_v31  ;;  %v211_v43 = vsel %vm206_vm0, %v205_v33, 0.0  ;;  %s391_s5 = sshll.u32 %s193_s30, 4  ;;  %s896_s5 = int_to_ptr.vmem [resolvable:$true] %s391_s5 }
  0x1f   : > { %286 = vmatpush1.msra.mxu0 %v249_v6  ;;  %507 = vmatpush1.msra.mxu1 %v249_v6  ;;  %v219_v37 = vsel %vm206_vm0, %v216_v29, 0.0  ;;  %v217_v42 = vmul.f32 %v204_v39, %v204_v39  ;;  %v212_v45 = vadd.f32 %v211_v43, %v204_v39  ;;  %s578_s10 = scalar_lea.vmem %s896_s5, 256  ;;  %p585_p0 = scmp.lt.s32.totalorder %s896_s5, %s583_s12 }
  0x20   : > { %287 = vmatprep.subr.mxu0 %v640_v1  ;;  %478 = vmatprep.subr.mxu1 %v640_v1  ;;  %v220_v41 = vadd.f32 %v219_v37, %v215_v34  ;;  %v223_v44 = vsel %vm206_vm0, %v218_v35, 0.0  ;;  %p579_p11 = scmp.ne.s32.totalorder %s896_s5, %s578_s10  ;;  %p586_p1 = scmp.lt.s32.totalorder %s584_s13, %s578_s10 }
  0x21   : > { %288 = vmatpush1.msra.mxu0 %v248_v7  ;;  %508 = vmatpush1.msra.mxu1 %v248_v7  ;;  %v224_v46 = vadd.f32 %v223_v44, %v217_v42 }
  0x22   : > { %289 = vmatprep.subr.mxu0 %v640_v1  ;;  %479 = vmatprep.subr.mxu1 %v640_v1  ;;  %p580_p12 = pnand %p579_p11, %p707_p5  ;;  %p587_p2 = por %p586_p1, %p585_p0 }
  0x23   : > { %290 = vmatpush1.msra.mxu0 %v247_v8  ;;  %509 = vmatpush1.msra.mxu1 %v247_v8  ;;  %v464_v8 = vld [vmem:[%s940_s2] ss:$0 sm:$0xff] }
  0x24   : > { %291 = vmatprep.subr.mxu0 %v640_v1  ;;  %480 = vmatprep.subr.mxu1 %v640_v1  ;;  %p581_p13 = pneg %p580_p12 }
  0x25   : > { %292 = vmatpush1.msra.mxu0 %v246_v9  ;;  %510 = vmatpush1.msra.mxu1 %v246_v9 }
  0x26   : > { %293 = vmatprep.subr.mxu0 %v640_v1  ;;  %481 = vmatprep.subr.mxu1 %v640_v1  ;;  %p588_p3 = pnand %p587_p2, %p581_p13 }
  0x27   : > { %294 = vmatpush1.msra.mxu0 %v245_v10  ;;  %511 = vmatpush1.msra.mxu1 %v245_v10 }
  0x28   : > { %295 = vmatprep.subr.mxu0 %v640_v1  ;;  %482 = vmatprep.subr.mxu1 %v640_v1 }
  0x29   : > { %296 = vmatpush1.msra.mxu0 %v244_v11  ;;  %512 = vmatpush1.msra.mxu1 %v244_v11 }
  0x2a   : > { %297 = vmatprep.subr.mxu0 %v640_v1  ;;  %483 = vmatprep.subr.mxu1 %v640_v1 }
  0x2b   : > { %298 = vmatpush1.msra.mxu0 %v243_v12  ;;  %513 = vmatpush1.msra.mxu1 %v243_v12 }
  0x2c   : > { %299 = vmatprep.subr.mxu0 %v640_v1  ;;  %484 = vmatprep.subr.mxu1 %v640_v1 }
  0x2d   : > { %300 = vmatpush1.msra.mxu0 %v242_v13  ;;  %514 = vmatpush1.msra.mxu1 %v242_v13 }
  0x2e   : > { %301 = vmatprep.subr.mxu0 %v640_v1  ;;  %485 = vmatprep.subr.mxu1 %v640_v1 }
  0x2f   : > { %302 = vmatpush1.msra.mxu0 %v241_v14  ;;  %515 = vmatpush1.msra.mxu1 %v241_v14 }
  0x30   : > { %303 = vmatprep.subr.mxu0 %v640_v1  ;;  %486 = vmatprep.subr.mxu1 %v640_v1 }
  0x31   : > { %304 = vmatpush1.msra.mxu0 %v240_v15  ;;  %516 = vmatpush1.msra.mxu1 %v240_v15 }
  0x32   : > { %305 = vmatprep.subr.mxu0 %v640_v1  ;;  %487 = vmatprep.subr.mxu1 %v640_v1 }
  0x33   : > { %306 = vmatpush1.msra.mxu0 %v239_v16  ;;  %517 = vmatpush1.msra.mxu1 %v239_v16 }
  0x34   : > { %311 = vmatprep.subr.mxu0 %v640_v1  ;;  %488 = vmatprep.subr.mxu1 %v640_v1 }
  0x35   : > { %312 = vmatpush2.msra.mxu0 %v268_v17  ;;  %518 = vmatpush2.msra.mxu1 %v268_v17 }
  0x36   : > { %313 = vmatprep.subr.mxu0 %v640_v1  ;;  %489 = vmatprep.subr.mxu1 %v640_v1 }
  0x37   : > { %314 = vmatpush2.msra.mxu0 %v267_v18  ;;  %519 = vmatpush2.msra.mxu1 %v267_v18 }
  0x38   : > { %315 = vmatprep.subr.mxu0 %v640_v1  ;;  %490 = vmatprep.subr.mxu1 %v640_v1 }
  0x39   : > { %316 = vmatpush2.msra.mxu0 %v266_v19  ;;  %520 = vmatpush2.msra.mxu1 %v266_v19 }
  0x3a   : > { %317 = vmatprep.subr.mxu0 %v640_v1  ;;  %491 = vmatprep.subr.mxu1 %v640_v1 }
  0x3b   : > { %318 = vmatpush2.msra.mxu0 %v265_v20  ;;  %521 = vmatpush2.msra.mxu1 %v265_v20 }
  0x3c   : > { %319 = vmatprep.subr.mxu0 %v640_v1  ;;  %492 = vmatprep.subr.mxu1 %v640_v1 }
  0x3d   : > { %320 = vmatpush2.msra.mxu0 %v264_v21  ;;  %522 = vmatpush2.msra.mxu1 %v264_v21 }
  0x3e   : > { %321 = vmatprep.subr.mxu0 %v640_v1  ;;  %493 = vmatprep.subr.mxu1 %v640_v1 }
  0x3f   : > { %322 = vmatpush2.msra.mxu0 %v263_v22  ;;  %523 = vmatpush2.msra.mxu1 %v263_v22 }
  0x40   : > { %323 = vmatprep.subr.mxu0 %v640_v1  ;;  %494 = vmatprep.subr.mxu1 %v640_v1 }
  0x41   : > { %324 = vmatpush2.msra.mxu0 %v262_v23  ;;  %524 = vmatpush2.msra.mxu1 %v262_v23 }
  0x42   : > { %325 = vmatprep.subr.mxu0 %v640_v1  ;;  %495 = vmatprep.subr.mxu1 %v640_v1 }
  0x43   : > { %326 = vmatpush2.msra.mxu0 %v261_v24  ;;  %525 = vmatpush2.msra.mxu1 %v261_v24 }
  0x44   : > { %327 = vmatprep.subr.mxu0 %v640_v1  ;;  %496 = vmatprep.subr.mxu1 %v640_v1 }
  0x45   : > { %328 = vmatpush2.msra.mxu0 %v260_v25  ;;  %526 = vmatpush2.msra.mxu1 %v260_v25 }
  0x46   : > { %329 = vmatprep.subr.mxu0 %v640_v1  ;;  %497 = vmatprep.subr.mxu1 %v640_v1 }
  0x47   : > { %330 = vmatpush2.msra.mxu0 %v259_v26  ;;  %527 = vmatpush2.msra.mxu1 %v259_v26 }
  0x48   : > { %331 = vmatprep.subr.mxu0 %v640_v1  ;;  %498 = vmatprep.subr.mxu1 %v640_v1 }
  0x49   : > { %332 = vmatpush2.msra.mxu0 %v258_v27  ;;  %528 = vmatpush2.msra.mxu1 %v258_v27 }
  0x4a   : > { %333 = vmatprep.subr.mxu0 %v640_v1  ;;  %499 = vmatprep.subr.mxu1 %v640_v1 }
  0x4b   : > { %334 = vmatpush2.msra.mxu0 %v257_v30  ;;  %529 = vmatpush2.msra.mxu1 %v257_v30 }
  0x4c   : > { %335 = vmatprep.subr.mxu0 %v640_v1  ;;  %500 = vmatprep.subr.mxu1 %v640_v1 }
  0x4d   : > { %336 = vmatpush2.msra.mxu0 %v256_v32  ;;  %530 = vmatpush2.msra.mxu1 %v256_v32 }
  0x4e   : > { %337 = vmatprep.subr.mxu0 %v640_v1  ;;  %501 = vmatprep.subr.mxu1 %v640_v1  ;;  %v463_v1 = vld [vmem:[%s941_s3] ss:$0 sm:$0xff] }
  0x4f   : > { %338 = vmatpush2.msra.mxu0 %v255_v38  ;;  %531 = vmatpush2.msra.mxu1 %v255_v38 }
  0x50   : > { %461 = vmatprep.mubr.msk.f32.mxu0 %vm206_vm0, %v203_v28  ;;  %462 = vmatprep.mubr.msk.f32.mxu1 %vm206_vm0, %v205_v33 }
  0x51   : > { %340 = vmatmul.mubr.f32.vlgmr.msra.gmra.mxu0 %v202_v31  ;;  %345 = vmatmul.mubr.f32.vlgmr.msra.gmra.mxu1 %v204_v39 }
  0x52   : > { %209 = vadd.xlane.f32.xlu0 %v208_v40  ;;  %221 = vadd.xlane.f32.xlu1 %v220_v41 }
  0x56   : > { %213 = vadd.xlane.f32.xlu0 %v212_v45  ;;  %225 = vadd.xlane.f32.xlu1 %v224_v46 }
  0xdb   : > { %v210_v47 = vpop.xlane.xlu0 %209  ;;  %v222_v48 = vpop.xlane.xlu1 %221 }
  0xdc   : > { %v227_v50 = vmul.f32 0.004166667, %v210_v47  ;;  %v229_v54 = vmul.f32 0.004166667, %v222_v48 }
  0xde   : > { %v231_v53 = vmul.f32 %v227_v50, %v227_v50 }
  0xdf   : > { %v214_v49 = vpop.xlane.xlu0 %213  ;;  %v226_v52 = vpop.xlane.xlu1 %225 }
  0xe0   : > { %v228_v51 = vmul.f32 0.004166667, %v214_v49  ;;  %v230_v56 = vmul.f32 0.004166667, %v226_v52  ;;  %v233_v57 = vsub.f32 %v229_v54, %v231_v53 }
  0xe2   : > { %v232_v55 = vmul.f32 %v228_v51, %v228_v51  ;;  %v235_v59 = vadd.f32 1e-05, %v233_v57 }
  0xe4   : > { %v234_v58 = vsub.f32 %v230_v56, %v232_v55  ;;  %574 = vrsqrt.f32 %v235_v59 }
  0xe6   : > { %v236_v60 = vadd.f32 1e-05, %v234_v58 }
  0xe8   : > { %576 = vrsqrt.f32 %v236_v60 }
  0xf1   : > { %v575_v61 = vpop.eup %574 }
  0xf2   : > { %v352_v63 = vmul.f32 %v575_v61, %v227_v50 }
  0xf4   : > { %v361_v5 = vmul.f32 %v463_v1, %v352_v63 }
  0xf5   : > { %v577_v62 = vpop.eup %576 }
  0xf6   : > { %v353_v0 = vmul.f32 %v577_v62, %v228_v51 }
  0xf8   : > { %v362_v7 = vmul.f32 %v463_v1, %v353_v0 }
 0x111   : > { %v341_v2 = vpop.f32.mrf.mxu0  ;;  %v346_v3 = vpop.f32.mrf.mxu1 }
 0x112   : > { %v350_v4 = vmul.f32 %v575_v61, %v341_v2  ;;  %v351_v6 = vmul.f32 %v577_v62, %v346_v3 }
 0x113   : > { %v343_v9 = vpop.f32.mrf.mxu0  ;;  %v348_v10 = vpop.f32.mrf.mxu1 }
 0x114   : > { %v363_v11 = vsub.f32 %v350_v4, %v361_v5  ;;  %v364_v12 = vsub.f32 %v351_v6, %v362_v7 }
 0x116   : > { %v372_v13 = vadd.f32 %v464_v8, %v363_v11  ;;  %v373_v14 = vadd.f32 %v464_v8, %v364_v12 }
 0x118   : > { %375 = vst.msk [vmem:[%s193_s30] sm:$0xff] %vm374_vm1, %v372_v13  ;;  %376 = vst.msk [vmem:[%s193_s30 + $0x8] sm:$0xff] %vm374_vm1, %v373_v14 }
 0x119   : > { %591 = shalt.err (!%p588_p3)
}
 0x11a   : > { %s592_s14 = scalar_lea.hbm %s894_s9, 256  ;;  %s596_s23 = scalar_lea.hbm %s942_s4, 512 }
 0x11b   : > { %p593_p4 = scmp.ne.s32.totalorder %s894_s9, %s592_s14  ;;  %p597_p9 = scmp.lt.s32.totalorder %s894_s9, %s942_s4 }
 0x11c   : > { %p598_p10 = scmp.lt.s32.totalorder %s596_s23, %s592_s14 }
 0x11d   : > { %p594_p7 = pnand %p593_p4, %p707_p5 }
 0x11e   : > { %p599_p11 = por %p598_p10, %p597_p9 }
 0x11f   : > { %p595_p8 = pneg %p594_p7 }
 0x121   : > { %p600_p12 = pnand %p599_p11, %p595_p8 }
 0x123   : > { %603 = shalt.err (!%p600_p12)
}
 0x124   : > { %s642_s30 = smov 128   ;;  %s643_s29 = smov 8  }
 0x125   : > { %532 = dma.vmem_to_hbm [thread:$0]  (%p707_p5), %s896_s5, 256, %s894_s9, %s898_s19, %s642_s30, %s642_s30, %s643_s29  }
 0x126 PF: > { %p538_p13 = scmp.ge.s32.totalorder %s638_s18, 2  ;;  %s406_s6 = sand.u32 1, %s626_s15  }
 0x127   : > { %s407_s7 = scalar_lea.sflag [#allocation3], %s406_s6 }
 0x128   : > { %p535_p0 = pnand %p538_p13, %p711_p6 }
 0x12a   : > { %p536_p1 = pneg %p535_p0 }
 0x12c   : > { %621 = dma.done.wait (%p536_p1), %s407_s7, 256  }
 0x12d   : > { %623 = vsyncadd (%p536_p1), %s407_s7, 4294967040  ;;  %p14_p2 = scmp.ge.s32.totalorder %s694_s21, 4   ;;  %s945_s15 = smov %s630_s16 }
 0x12e   : > { %s946_s16 = smov %s634_s17  ;;  %s947_s17 = smov %s705_s24 }
 0x12f   : > { %s948_s18 = smov %s694_s21  ;;  %16 = sbr.rel (!%p14_p2) target bundleno = 3 (0x3), region = 71 }
 0x134   :  { %412 = vsyncpa [#allocation3], 1 }
 0x135   :  { %414 = vsyncpa [#allocation3 + $0x1], 1 }

</bundles_post_ra>
